<compile_context>
chip_gen: v6e
topology: v6e:2x2x1
jax: 0.10.0
libtpu: 0.0.40
codegen_flags: <defaults>
</compile_context>

<pallas_src>
import functools

import jax
import jax.numpy as jnp
from jax.experimental import pallas as pl
from jax.experimental.pallas import tpu as pltpu

N_HIDDEN = 5
LANES = 128
SUBLANES = 8


def mlp_kernel(params_ref, x_ref, o_ref, *, n, compute_dtype):
    # params_ref (SMEM, shape (3n+1,)): [w1_0..w1_{n-1}, b1_0..b1_{n-1},
    #                                    w2_0..w2_{n-1}, b2]
    # x_ref / o_ref: (block_rows, 128) f32, batch laid out lane-dense.
    x = x_ref[...].astype(compute_dtype)
    # Fold b2 into the accumulator init (saves one vector add per vreg).
    acc = jnp.full_like(x, params_ref[3 * n].astype(compute_dtype))
    # Static unroll over the n=5 hidden units: scalar-broadcast FMAs + tanh.
    # (If a bundle dump shows EUP-bound tanh lowering to 2xexp+div, rewrite as
    #  1 - 2*pl.reciprocal(exp(2a)+1); not done by default.)
    for j in range(n):
        w1j = params_ref[j].astype(compute_dtype)
        b1j = params_ref[n + j].astype(compute_dtype)
        w2j = params_ref[2 * n + j].astype(compute_dtype)
        acc = acc + w2j * jnp.tanh(x * w1j + b1j)
    o_ref[...] = acc.astype(o_ref.dtype)


def _reference(x, w1, b1, w2, b2):
    return jnp.tanh(x @ w1 + b1[None, :]) @ w2 + b2[None, :]


def mlp_forward(x, w1, b1, w2, b2, *, block_rows=1024,
                compute_dtype=jnp.float32,
                small_batch_fallback=True,
                min_kernel_slab_bytes=1 << 20):
    """x: (B, 1) f32.  w1: (1, n), b1: (n,), w2: (n, 1), b2: (1,)."""
    B = x.shape[0]
    n = w1.shape[1]
    x = x.astype(jnp.float32)

    # ---- lane-dense batch layout: (B,) -> (rows, 128) slab ------------------
    rows = -(-B // LANES)                       # ceil(B / 128)
    padded = rows * LANES

    # Tiny-batch fallback: the kernel is pure launch/DMA overhead there.
    if small_batch_fallback and padded * 4 < min_kernel_slab_bytes:
        return _reference(x, w1.astype(jnp.float32), b1.astype(jnp.float32),
                          w2.astype(jnp.float32), b2.astype(jnp.float32))

    x_flat = jnp.ravel(x)
    if padded != B:                             # only pad when actually needed
        x_flat = jnp.pad(x_flat, (0, padded - B))
    x2d = x_flat.reshape(rows, LANES)           # free bitcast when no pad

    # ---- choose block_rows ---------------------------------------------------
    block_rows = min(block_rows, rows)
    if block_rows < rows:
        # Tiled blocks must have a sublane dim divisible by 8.
        block_rows = max(SUBLANES, (block_rows // SUBLANES) * SUBLANES)
    if block_rows >= rows and rows >= 2 * SUBLANES:
        # Ensure >= 2 grid steps so v7x's two TensorCores both get work.
        half = (rows + 1) // 2
        block_rows = -(-half // SUBLANES) * SUBLANES
    grid = (pl.cdiv(rows, block_rows),)         # ragged last block is masked

    # ---- pack all weights as SMEM scalars ------------------------------------
    params = jnp.concatenate([
        w1.reshape(-1), b1.reshape(-1), w2.reshape(-1), b2.reshape(-1),
    ]).astype(jnp.float32)                      # (3n + 1,)

    cost = pl.CostEstimate(
        flops=int(padded) * (4 * n + 1),
        transcendentals=int(padded) * n,
        bytes_accessed=2 * int(padded) * 4 + (3 * n + 1) * 4,
    )

    out2d = pl.pallas_call(
        functools.partial(mlp_kernel, n=n, compute_dtype=compute_dtype),
        out_shape=jax.ShapeDtypeStruct((rows, LANES), jnp.float32),
        grid=grid,
        in_specs=[
            pl.BlockSpec(memory_space=pltpu.MemorySpace.SMEM),      # params
            pl.BlockSpec((block_rows, LANES), lambda i: (i, 0)),    # x slab
        ],
        out_specs=pl.BlockSpec((block_rows, LANES), lambda i: (i, 0)),
        compiler_params=pltpu.CompilerParams(
            dimension_semantics=("parallel",),
        ),
        cost_estimate=cost,
    )(params, x2d)

    out = out2d.reshape(-1)
    if padded != B:
        out = out[:B]
    return out.reshape(B, 1)


def init_params(key, n=N_HIDDEN):
    """Deterministic init mirroring nn.Linear shapes: Linear(1,n), Linear(n,1)."""
    k1, k2, k3, k4 = jax.random.split(key, 4)
    # PyTorch default init: U(-1/sqrt(fan_in), 1/sqrt(fan_in))
    w1 = jax.random.uniform(k1, (1, n), jnp.float32, -1.0, 1.0)        # fan_in = 1
    b1 = jax.random.uniform(k2, (n,), jnp.float32, -1.0, 1.0)
    bound2 = 1.0 / jnp.sqrt(float(n))
    w2 = jax.random.uniform(k3, (n, 1), jnp.float32, -bound2, bound2)  # fan_in = n
    b2 = jax.random.uniform(k4, (1,), jnp.float32, -bound2, bound2)
    return w1, b1, w2, b2


if __name__ == "__main__":
    key = jax.random.PRNGKey(0)
    kp, kx1, kx2 = jax.random.split(key, 3)
    w1, b1, w2, b2 = init_params(kp)

    # Small batch (module-consistent): force the kernel path (pad + slice path).
    B_small = 8
    x_small = jax.random.normal(kx1, (B_small, 1), jnp.float32)
    y_small = mlp_forward(x_small, w1, b1, w2, b2, small_batch_fallback=False)
    y_small = jax.block_until_ready(y_small)
    ref_small = _reference(x_small, w1, b1, w2, b2)
    assert y_small.shape == (B_small, 1)
    assert jnp.allclose(y_small, ref_small, atol=1e-5, rtol=1e-5)

    # Lane-aligned batch: exercises the no-pad / no-slice fast path and a
    # multi-block grid (>= 2 steps for v7x megacore sharding).
    B_big = 4096
    x_big = jax.random.normal(kx2, (B_big, 1), jnp.float32)
    y_big = mlp_forward(x_big, w1, b1, w2, b2, small_batch_fallback=False)
    y_big = jax.block_until_ready(y_big)
    ref_big = _reference(x_big, w1, b1, w2, b2)
    assert y_big.shape == (B_big, 1)
    assert jnp.allclose(y_big, ref_big, atol=1e-5, rtol=1e-5)

    print("KERNEL_OK")
</pallas_src>

<mosaic_0001>
module attributes {stable_mosaic.version = 11 : i64} {
  func.func @mlp_kernel(%arg0: i32, %arg1: memref<16xf32, #tpu.memory_space<smem>>, %arg2: memref<1x128xf32, #tpu.memory_space<vmem>>, %arg3: memref<1x128xf32, #tpu.memory_space<vmem>>) attributes {dimension_semantics = [#tpu.dimension_semantics<parallel>], iteration_bounds = array<i64: 1>, scalar_prefetch = 0 : i64, scratch_operands = 0 : i64, tpu.core_type = #tpu.core_type<tc>, window_params = [{transform_indices = @transform_0, window_bounds = array<i64: 16>}, {transform_indices = @transform_1, window_bounds = array<i64: 1, 128>}, {transform_indices = @transform_2, window_bounds = array<i64: 1, 128>}]} {
    %c0 = arith.constant 0 : index
    %c0_0 = arith.constant 0 : index
    %0 = vector.load %arg2[%c0, %c0_0] : memref<1x128xf32, #tpu.memory_space<vmem>>, vector<1x128xf32>
    %c15 = arith.constant 15 : index
    %1 = memref.load %arg1[%c15] : memref<16xf32, #tpu.memory_space<smem>>
    %2 = vector.broadcast %1 : f32 to vector<1x128xf32>
    %c0_1 = arith.constant 0 : index
    %3 = memref.load %arg1[%c0_1] : memref<16xf32, #tpu.memory_space<smem>>
    %c5 = arith.constant 5 : index
    %4 = memref.load %arg1[%c5] : memref<16xf32, #tpu.memory_space<smem>>
    %c10 = arith.constant 10 : index
    %5 = memref.load %arg1[%c10] : memref<16xf32, #tpu.memory_space<smem>>
    %6 = vector.broadcast %3 : f32 to vector<1x128xf32>
    %7 = arith.mulf %0, %6 : vector<1x128xf32>
    %8 = vector.broadcast %4 : f32 to vector<1x128xf32>
    %9 = arith.addf %7, %8 : vector<1x128xf32>
    %10 = math.tanh %9 : vector<1x128xf32>
    %11 = vector.broadcast %5 : f32 to vector<1x128xf32>
    %12 = arith.mulf %11, %10 : vector<1x128xf32>
    %13 = arith.addf %2, %12 : vector<1x128xf32>
    %c1 = arith.constant 1 : index
    %14 = memref.load %arg1[%c1] : memref<16xf32, #tpu.memory_space<smem>>
    %c6 = arith.constant 6 : index
    %15 = memref.load %arg1[%c6] : memref<16xf32, #tpu.memory_space<smem>>
    %c11 = arith.constant 11 : index
    %16 = memref.load %arg1[%c11] : memref<16xf32, #tpu.memory_space<smem>>
    %17 = vector.broadcast %14 : f32 to vector<1x128xf32>
    %18 = arith.mulf %0, %17 : vector<1x128xf32>
    %19 = vector.broadcast %15 : f32 to vector<1x128xf32>
    %20 = arith.addf %18, %19 : vector<1x128xf32>
    %21 = math.tanh %20 : vector<1x128xf32>
    %22 = vector.broadcast %16 : f32 to vector<1x128xf32>
    %23 = arith.mulf %22, %21 : vector<1x128xf32>
    %24 = arith.addf %13, %23 : vector<1x128xf32>
    %c2 = arith.constant 2 : index
    %25 = memref.load %arg1[%c2] : memref<16xf32, #tpu.memory_space<smem>>
    %c7 = arith.constant 7 : index
    %26 = memref.load %arg1[%c7] : memref<16xf32, #tpu.memory_space<smem>>
    %c12 = arith.constant 12 : index
    %27 = memref.load %arg1[%c12] : memref<16xf32, #tpu.memory_space<smem>>
    %28 = vector.broadcast %25 : f32 to vector<1x128xf32>
    %29 = arith.mulf %0, %28 : vector<1x128xf32>
    %30 = vector.broadcast %26 : f32 to vector<1x128xf32>
    %31 = arith.addf %29, %30 : vector<1x128xf32>
    %32 = math.tanh %31 : vector<1x128xf32>
    %33 = vector.broadcast %27 : f32 to vector<1x128xf32>
    %34 = arith.mulf %33, %32 : vector<1x128xf32>
    %35 = arith.addf %24, %34 : vector<1x128xf32>
    %c3 = arith.constant 3 : index
    %36 = memref.load %arg1[%c3] : memref<16xf32, #tpu.memory_space<smem>>
    %c8 = arith.constant 8 : index
    %37 = memref.load %arg1[%c8] : memref<16xf32, #tpu.memory_space<smem>>
    %c13 = arith.constant 13 : index
    %38 = memref.load %arg1[%c13] : memref<16xf32, #tpu.memory_space<smem>>
    %39 = vector.broadcast %36 : f32 to vector<1x128xf32>
    %40 = arith.mulf %0, %39 : vector<1x128xf32>
    %41 = vector.broadcast %37 : f32 to vector<1x128xf32>
    %42 = arith.addf %40, %41 : vector<1x128xf32>
    %43 = math.tanh %42 : vector<1x128xf32>
    %44 = vector.broadcast %38 : f32 to vector<1x128xf32>
    %45 = arith.mulf %44, %43 : vector<1x128xf32>
    %46 = arith.addf %35, %45 : vector<1x128xf32>
    %c4 = arith.constant 4 : index
    %47 = memref.load %arg1[%c4] : memref<16xf32, #tpu.memory_space<smem>>
    %c9 = arith.constant 9 : index
    %48 = memref.load %arg1[%c9] : memref<16xf32, #tpu.memory_space<smem>>
    %c14 = arith.constant 14 : index
    %49 = memref.load %arg1[%c14] : memref<16xf32, #tpu.memory_space<smem>>
    %50 = vector.broadcast %47 : f32 to vector<1x128xf32>
    %51 = arith.mulf %0, %50 : vector<1x128xf32>
    %52 = vector.broadcast %48 : f32 to vector<1x128xf32>
    %53 = arith.addf %51, %52 : vector<1x128xf32>
    %54 = math.tanh %53 : vector<1x128xf32>
    %55 = vector.broadcast %49 : f32 to vector<1x128xf32>
    %56 = arith.mulf %55, %54 : vector<1x128xf32>
    %57 = arith.addf %46, %56 : vector<1x128xf32>
    %c0_2 = arith.constant 0 : index
    %c0_3 = arith.constant 0 : index
    %58 = vector.load %arg3[%c0_2, %c0_3] : memref<1x128xf32, #tpu.memory_space<vmem>>, vector<1x128xf32>
    tpu.vector_store %arg3[%c0_2, %c0_3], %57 {strides = array<i32>} : memref<1x128xf32, #tpu.memory_space<vmem>>, vector<1x128xf32>,
    return
  }
  func.func @transform_0(%arg0: i32) -> i32 {
    %c0_i32 = arith.constant 0 : i32
    %c0_i32_0 = arith.constant 0 : i32
    return %c0_i32 : i32
  }
  func.func @transform_1(%arg0: i32) -> (i32, i32) {
    %c0_i32 = arith.constant 0 : i32
    %c0_i32_0 = arith.constant 0 : i32
    return %arg0, %c0_i32 : i32, i32
  }
  func.func @transform_2(%arg0: i32) -> (i32, i32) {
    %c0_i32 = arith.constant 0 : i32
    %c0_i32_0 = arith.constant 0 : i32
    return %arg0, %c0_i32 : i32, i32
  }
}

</mosaic_0001>

<bundles_post_ra>
// kernel: tpu_custom_call.1
= control target key start
LH: loop header
LB: loop body
LE: loop exit
PB: predicated region body
PF: predicated region fallthrough
CT: control target
= control target key end

     0   :  { %7 = vsyncpa [#allocation4], 0  ;;  %s182_s0 = inlined_call_operand.hbm [shape: f32[16], index: 0, kind: input, shape index: {}]   ;;  %s183_s1 = inlined_call_operand.vmem [shape: f32[1,128], index: 1, kind: input, shape index: {}]   ;;  %s184_s2 = inlined_call_operand.hbm [shape: f32[1,128], index: 2, kind: output, shape index: {}]  }
   0x1   :  { %8 = vsyncpa [#allocation3], 0  ;;  %s156_s9 = smov [#allocation2]  }
   0x2   :  { %16 = dma.hbm_to_smem %s182_s0, 16, %s156_s9, [#allocation4]  }
   0x3   :  { %152 = dma.done.wait [#allocation4], 16  }
   0x4   :  { %153 = vsyncadd [#allocation4], 4294967280 }
   0x5   :  { %22 = sfence }
   0x6   :  { %s26_s12 = sld [smem:[#allocation2]]  ;;  %v23_v0 = vld [vmem:[%s183_s1] sm:$0x1]  ;;  %s157_s28 = smov [#allocation5]  }
   0x7   :  { %s98_s13 = sld [smem:[#allocation2 + $0x5]]  ;;  %s88_s29 = sshll.u32 %s157_s28, 4  ;;  %s89_s29 = int_to_ptr.vmem [resolvable:$true] %s88_s29 }
   0x8   :  { %s100_s14 = sld [smem:[#allocation2 + $0x1]]  ;;  %s132_s30 = scalar_lea.vmem %s89_s29, 16 }
   0x9   :  { %s101_s17 = sld [smem:[#allocation2 + $0x6]]  ;;  %p133_p0 = scmp.ne.s32.totalorder %s89_s29, %s132_s30 }
   0xa   :  { %s103_s18 = sld [smem:[#allocation2 + $0x2]]  ;;  %s136_s3 = scalar_lea.vmem %s89_s29, 32 }
   0xb   :  { %s104_s19 = sld [smem:[#allocation2 + $0x7]]  ;;  %p137_p1 = scmp.lt.s32.totalorder %s89_s29, %s89_s29 }
   0xc   :  { %v29_v1 = vstv %s26_s12  ;;  %s106_s20 = sld [smem:[#allocation2 + $0x3]]  ;;  %p138_p2 = scmp.lt.s32.totalorder %s136_s3, %s132_s30 }
   0xd   :  { %v30_v2 = vmul.f32 %v29_v1, %v23_v0  ;;  %v31_v3 = vstv %s98_s13  ;;  %s107_s0 = sld [smem:[#allocation2 + $0x8]] }
   0xe   :  { %v40_v5 = vstv %s100_s14  ;;  %s109_s21 = sld [smem:[#allocation2 + $0x4]]  ;;  %p139_p3 = por %p138_p2, %p137_p1 }
   0xf   :  { %v32_v4 = vadd.f32 %v31_v3, %v30_v2  ;;  %v41_v6 = vmul.f32 %v40_v5, %v23_v0  ;;  %v42_v7 = vstv %s101_s17  ;;  %s110_s22 = sld [smem:[#allocation2 + $0x9]] }
  0x10   :  { %v51_v9 = vstv %s103_s18  ;;  %s99_s1 = sld [smem:[#allocation2 + $0xa]]  ;;  %p140_p4 = pnand %p139_p3, %p133_p0 }
  0x11   :  { %114 = vtanh.f32 %v32_v4  ;;  %v43_v8 = vadd.f32 %v42_v7, %v41_v6  ;;  %v52_v10 = vmul.f32 %v51_v9, %v23_v0  ;;  %v53_v11 = vstv %s104_s19  ;;  %s97_s23 = sld [smem:[#allocation2 + $0xf]] }
  0x12   :  { %v62_v13 = vstv %s106_s20  ;;  %s102_s24 = sld [smem:[#allocation2 + $0xb]] }
  0x13   :  { %116 = vtanh.f32 %v43_v8  ;;  %v54_v12 = vadd.f32 %v53_v11, %v52_v10  ;;  %v63_v14 = vmul.f32 %v62_v13, %v23_v0  ;;  %v64_v15 = vstv %s107_s0  ;;  %s105_s25 = sld [smem:[#allocation2 + $0xc]] }
  0x14   :  { %v73_v17 = vstv %s109_s21  ;;  %s108_s26 = sld [smem:[#allocation2 + $0xd]] }
  0x15   :  { %118 = vtanh.f32 %v54_v12  ;;  %v65_v16 = vadd.f32 %v64_v15, %v63_v14  ;;  %v74_v18 = vmul.f32 %v73_v17, %v23_v0  ;;  %v75_v19 = vstv %s110_s22  ;;  %s111_s27 = sld [smem:[#allocation2 + $0xe]] }
  0x16   :  { %v34_v21 = vstv %s99_s1 }
  0x17   :  { %120 = vtanh.f32 %v65_v16  ;;  %v76_v20 = vadd.f32 %v75_v19, %v74_v18  ;;  %v25_v23 = vstv %s97_s23 }
  0x18   :  { %v45_v25 = vstv %s102_s24 }
  0x19   :  { %122 = vtanh.f32 %v76_v20  ;;  %v56_v29 = vstv %s105_s25 }
  0x1a   :  { %v67_v33 = vstv %s108_s26 }
  0x1b   :  { %v78_v37 = vstv %s111_s27 }
  0x1e   :  { %v115_v22 = vpop.eup %114 }
  0x1f   :  { %v35_v24 = vmul.f32 %v115_v22, %v34_v21 }
  0x20   :  { %v117_v26 = vpop.eup %116 }
  0x21   :  { %v36_v27 = vadd.f32 %v35_v24, %v25_v23  ;;  %v46_v28 = vmul.f32 %v117_v26, %v45_v25 }
  0x22   :  { %v119_v30 = vpop.eup %118 }
  0x23   :  { %v47_v31 = vadd.f32 %v46_v28, %v36_v27  ;;  %v57_v32 = vmul.f32 %v119_v30, %v56_v29 }
  0x24   :  { %v121_v34 = vpop.eup %120 }
  0x25   :  { %v58_v35 = vadd.f32 %v57_v32, %v47_v31  ;;  %v68_v36 = vmul.f32 %v121_v34, %v67_v33 }
  0x26   :  { %v123_v38 = vpop.eup %122 }
  0x27   :  { %v69_v39 = vadd.f32 %v68_v36, %v58_v35  ;;  %v79_v40 = vmul.f32 %v123_v38, %v78_v37 }
  0x29   :  { %v80_v41 = vadd.f32 %v79_v40, %v69_v39 }
  0x2b   :  { %81 = vst [vmem:[#allocation5] sm:$0x1] %v80_v41 }
  0x2c   :  { %143 = shalt.err (!%p140_p4)
}
  0x2d   :  { %91 = dma.vmem_to_hbm [thread:$0]  %s89_s29, 16, %s184_s2, [#allocation3]  }
  0x2e   :  { %154 = dma.done.wait [#allocation3], 16  }
  0x2f   :  { %155 = vsyncadd [#allocation3], 4294967280 }
  0x30   :  { %95 = vsyncpa [#allocation3], 1 }
  0x31   :  { %96 = vsyncpa [#allocation4], 1 }

</bundles_post_ra>
